<compile_context>
chip_gen: v6e
topology: v6e:2x2x1
jax: 0.10.0
libtpu: 0.0.40
codegen_flags: <defaults>
</compile_context>

<pallas_src>
import jax
import jax.numpy as jnp
from jax import lax
from jax.experimental import pallas as pl
from jax.experimental.pallas import tpu as pltpu

LIF_BETA = 0.9     # membrane leak
LIF_THRESH = 1.0   # firing threshold
BN_EPS = 1e-5


def _round_up(x, m):
    return ((x + m - 1) // m) * m


def _pick_tile_hw(hw, cap=512):
    """Largest divisor of hw that is <= cap and a multiple of 8 (sublanes); else full hw."""
    for t in range(min(cap, hw), 7, -1):
        if hw % t == 0 and t % 8 == 0:
            return t
    return hw


def blockgen_kernel(patches_ref, w_ref, shift_ref, v_ref, out_ref, vout_ref):
    """One (batch, spatial-tile) block per grid step.

    patches_ref: (1, T, 9*Cin)   bf16  im2col patches of the padded input
    w_ref:       (9*Cin, 2*Cp)   bf16  [:, :Cp]  = 3x3 weights with BN scale folded in
                                       [:, Cp:]  = 1x1 weights in the center-tap rows, 0 elsewhere
    shift_ref:   (1, Cp)         f32   folded BatchNorm shift (beta - mean*scale)
    v_ref:       (1, T, Cp)      f32   LIF membrane potential (incoming state)
    out_ref:     (1, T, Cp)      f32   block output (sum over the two branches)
    vout_ref:    (1, T, Cp)      f32   new LIF membrane potential (aliased with v input)
    """
    cp = shift_ref.shape[-1]

    # One MXU pass produces both branches: columns [:Cp] -> conv3x3 (BN scale pre-folded),
    # columns [Cp:] -> conv1x1 (only the center-tap rows of w are non-zero there).
    y = jnp.dot(patches_ref[0], w_ref[...], preferred_element_type=jnp.float32)  # (T, 2*Cp)

    # ---- branch 0: conv3x3 -> BatchNorm shift -> LIF (stateful) ----
    y3 = y[:, :cp] + shift_ref[...]
    v_new = LIF_BETA * v_ref[0] + y3                      # integrate
    spike = (v_new >= LIF_THRESH).astype(jnp.float32)     # fire
    vout_ref[0] = v_new - spike * LIF_THRESH              # soft reset -> new state

    # ---- branch 1: conv1x1 ----
    y1 = y[:, cp:]

    # ---- BlockGen: sum over the branch axis ----
    out_ref[0] = spike + y1


def blockgen_forward(x_nchw, params, v_state=None, *, tile_hw=None):
    """Pallas-backed forward.  x_nchw: (B, Cin, H, W) float32.

    Returns (out_nchw, new_state) mirroring the PyTorch module's
    (tensor, ListState) contract; new_state is the LIF membrane in NCHW.
    """
    B, Cin, H, W = x_nchw.shape
    w3_t = params["w3"]                       # (Cout, Cin, 3, 3) -- PyTorch OIHW
    w1_t = params["w1"]                       # (Cout, Cin, 1, 1)
    Cout = w3_t.shape[0]
    HW = H * W
    Cp = _round_up(Cout, 128)                 # lane-dense output channels

    if tile_hw is None:
        tile_hw = _pick_tile_hw(HW)
    assert HW % tile_hw == 0, "tile_hw must divide H*W"

    # ---- glue: layout change + im2col (pure data movement), bf16 for HBM/MXU ----
    x = jnp.transpose(x_nchw, (0, 2, 3, 1))                           # NHWC
    xpad = jnp.pad(x, ((0, 0), (1, 1), (1, 1), (0, 0)))               # pad=1
    patches = jnp.stack(
        [xpad[:, dy:dy + H, dx:dx + W, :] for dy in range(3) for dx in range(3)],
        axis=3,
    ).reshape(B, HW, 9 * Cin).astype(jnp.bfloat16)
    # TODO(synk): bigger structural win -- drop im2col entirely and accumulate 9 shifted
    # (T,Cin)@(Cin,Cout) matmuls in-kernel with halo'd input tiles (cuts HBM read ~9x).

    # ---- glue: parameter folding / re-layout ----
    scale = params["bn_gamma"] / jnp.sqrt(params["bn_var"] + BN_EPS)  # (Cout,)
    shift = params["bn_beta"] - params["bn_mean"] * scale             # (Cout,)
    # row index of w3_mat is (ky*3+kx)*Cin + ci -> matches the patch flattening above
    w3_mat = jnp.transpose(w3_t, (2, 3, 1, 0)).reshape(9 * Cin, Cout)
    w3_mat = w3_mat * scale[None, :]                                  # fold BN scale
    w1_mat = w1_t[:, :, 0, 0].T                                       # (Cin, Cout)
    w1_big = jnp.zeros((9 * Cin, Cout), jnp.float32)
    w1_big = w1_big.at[4 * Cin:5 * Cin, :].set(w1_mat)                # center-tap rows

    def pad_c(a):                                                     # pad Cout -> Cp
        return jnp.pad(a, ((0, 0), (0, Cp - Cout)))

    w_comb = jnp.concatenate([pad_c(w3_mat), pad_c(w1_big)], axis=1)  # (9*Cin, 2*Cp)
    w_comb = w_comb.astype(jnp.bfloat16)
    shift_p = jnp.pad(shift, (0, Cp - Cout)).reshape(1, Cp).astype(jnp.float32)

    if v_state is None:
        v0 = jnp.zeros((B, HW, Cp), jnp.float32)
    else:
        v0 = jnp.transpose(v_state, (0, 2, 3, 1)).reshape(B, HW, Cout)
        v0 = jnp.pad(v0, ((0, 0), (0, 0), (0, Cp - Cout))).astype(jnp.float32)

    out_flat, v_flat = pl.pallas_call(
        blockgen_kernel,
        out_shape=(
            jax.ShapeDtypeStruct((B, HW, Cp), jnp.float32),
            jax.ShapeDtypeStruct((B, HW, Cp), jnp.float32),
        ),
        grid_spec=pltpu.PrefetchScalarGridSpec(
            num_scalar_prefetch=0,
            grid=(B, HW // tile_hw),
            in_specs=[
                pl.BlockSpec((1, tile_hw, 9 * Cin), lambda b, s: (b, s, 0)),
                pl.BlockSpec((9 * Cin, 2 * Cp), lambda b, s: (0, 0)),
                pl.BlockSpec((1, Cp), lambda b, s: (0, 0)),
                pl.BlockSpec((1, tile_hw, Cp), lambda b, s: (b, s, 0)),
            ],
            out_specs=[
                pl.BlockSpec((1, tile_hw, Cp), lambda b, s: (b, s, 0)),
                pl.BlockSpec((1, tile_hw, Cp), lambda b, s: (b, s, 0)),
            ],
        ),
        compiler_params=pltpu.CompilerParams(
            dimension_semantics=("parallel", "parallel"),
            vmem_limit_bytes=48 * 1024 * 1024,
        ),
        input_output_aliases={3: 1},   # LIF membrane state updated in place
    )(patches, w_comb, shift_p, v0)

    # slice off channel padding BEFORE the NCHW transpose
    out_nchw = jnp.transpose(out_flat[..., :Cout].reshape(B, H, W, Cout), (0, 3, 1, 2))
    v_nchw = jnp.transpose(v_flat[..., :Cout].reshape(B, H, W, Cout), (0, 3, 1, 2))
    return out_nchw, v_nchw


def reference_forward(x_nchw, params, v_state=None):
    """Plain-JAX reference matching the module semantics and the kernel's numerics
    (BN scale folded into w3, matmul operands quantized to bf16, f32 accumulation)."""
    Cout = params["w3"].shape[0]
    scale = params["bn_gamma"] / jnp.sqrt(params["bn_var"] + BN_EPS)
    shift = (params["bn_beta"] - params["bn_mean"] * scale).reshape(1, Cout, 1, 1)
    w3s = (params["w3"] * scale[:, None, None, None]).astype(jnp.bfloat16).astype(jnp.float32)
    w1q = params["w1"].astype(jnp.bfloat16).astype(jnp.float32)
    xq = x_nchw.astype(jnp.bfloat16).astype(jnp.float32)

    y3 = lax.conv_general_dilated(
        xq, w3s, (1, 1), ((1, 1), (1, 1)),
        dimension_numbers=("NCHW", "OIHW", "NCHW")) + shift
    v = jnp.zeros_like(y3) if v_state is None else v_state
    v_new = LIF_BETA * v + y3
    spike = (v_new >= LIF_THRESH).astype(jnp.float32)
    v_out = v_new - spike * LIF_THRESH
    y1 = lax.conv_general_dilated(
        xq, w1q, (1, 1), ((0, 0), (0, 0)),
        dimension_numbers=("NCHW", "OIHW", "NCHW"))
    return spike + y1, v_out


def init_params(key, c_in, c_out):
    k1, k2, k3, k4, k5, k6 = jax.random.split(key, 6)
    return {
        "w3": 0.3 * jax.random.normal(k1, (c_out, c_in, 3, 3), jnp.float32),
        "w1": 0.3 * jax.random.normal(k2, (c_out, c_in, 1, 1), jnp.float32),
        "bn_gamma": 1.0 + 0.1 * jax.random.normal(k3, (c_out,), jnp.float32),
        "bn_beta": 0.1 * jax.random.normal(k4, (c_out,), jnp.float32),
        "bn_mean": 0.1 * jax.random.normal(k5, (c_out,), jnp.float32),
        "bn_var": jnp.abs(jax.random.normal(k6, (c_out,), jnp.float32)) + 0.5,
    }


if __name__ == "__main__":
    key = jax.random.PRNGKey(0)
    kx, kp = jax.random.split(key)

    B, Cin, H, W = 2, 4, 16, 16
    Cout = 8
    x = jax.random.normal(kx, (B, Cin, H, W), jnp.float32)
    params = init_params(kp, Cin, Cout)

    fwd = jax.jit(blockgen_forward, static_argnames=("tile_hw",))

    # step 1 (no incoming state); tile_hw=128 exercises both grid axes (grid = (2, 2))
    out, state = fwd(x, params, None, tile_hw=128)
    out = jax.block_until_ready(out)
    state = jax.block_until_ready(state)

    ref_out, ref_state = reference_forward(x, params, None)
    assert out.shape == (B, Cout, H, W)
    assert state.shape == (B, Cout, H, W)
    assert jnp.allclose(out, ref_out, atol=1e-3, rtol=1e-3), "output mismatch (step 1)"
    assert jnp.allclose(state, ref_state, atol=1e-3, rtol=1e-3), "state mismatch (step 1)"

    # step 2 (stateful path): feed the same membrane state to kernel and reference
    out2, state2 = fwd(x, params, ref_state, tile_hw=128)
    out2 = jax.block_until_ready(out2)
    state2 = jax.block_until_ready(state2)
    ref_out2, ref_state2 = reference_forward(x, params, ref_state)
    assert jnp.allclose(out2, ref_out2, atol=1e-3, rtol=1e-3), "output mismatch (step 2)"
    assert jnp.allclose(state2, ref_state2, atol=1e-3, rtol=1e-3), "state mismatch (step 2)"

    print("KERNEL_OK")
</pallas_src>

<mosaic_0001>
module attributes {stable_mosaic.version = 11 : i64} {
  func.func @blockgen_kernel(%arg0: i32, %arg1: i32, %arg2: memref<1x128x36xbf16, #tpu.memory_space<vmem>>, %arg3: memref<36x256xbf16, #tpu.memory_space<vmem>>, %arg4: memref<1x128xf32, #tpu.memory_space<vmem>>, %arg5: memref<1x128x128xf32, #tpu.memory_space<vmem>>, %arg6: memref<1x128x128xf32, #tpu.memory_space<vmem>>, %arg7: memref<1x128x128xf32, #tpu.memory_space<vmem>>) attributes {dimension_semantics = [#tpu.dimension_semantics<parallel>, #tpu.dimension_semantics<parallel>], iteration_bounds = array<i64: 2, 2>, scalar_prefetch = 0 : i64, scratch_operands = 0 : i64, tpu.core_type = #tpu.core_type<tc>, window_params = [{transform_indices = @transform_0, window_bounds = array<i64: 1, 128, 36>}, {pipeline_mode = #tpu.pipeline_mode<synchronous>, transform_indices = @transform_1, window_bounds = array<i64: 36, 256>}, {pipeline_mode = #tpu.pipeline_mode<synchronous>, transform_indices = @transform_2, window_bounds = array<i64: 1, 128>}, {transform_indices = @transform_3, window_bounds = array<i64: 1, 128, 128>}, {transform_indices = @transform_4, window_bounds = array<i64: 1, 128, 128>}, {transform_indices = @transform_5, window_bounds = array<i64: 1, 128, 128>}]} {
    %c0 = arith.constant 0 : index
    %c0_0 = arith.constant 0 : index
    %c0_1 = arith.constant 0 : index
    %0 = vector.load %arg2[%c0, %c0_0, %c0_1] : memref<1x128x36xbf16, #tpu.memory_space<vmem>>, vector<1x128x36xbf16>
    %1 = vector.shape_cast %0 : vector<1x128x36xbf16> to vector<128x36xbf16>
    %c0_2 = arith.constant 0 : index
    %c0_3 = arith.constant 0 : index
    %2 = vector.load %arg3[%c0_2, %c0_3] : memref<36x256xbf16, #tpu.memory_space<vmem>>, vector<36x256xbf16>
    %cst = arith.constant dense<0.000000e+00> : vector<128x256xf32>
    %3 = tpu.matmul %1, %2, %cst {dimension_numbers = #tpu.dot_dimension_numbers<[1], [0], [0], [1], [0, 0, 1, 1], [], []>} : vector<128x36xbf16>, vector<36x256xbf16>, vector<128x256xf32> -> vector<128x256xf32>
    %4 = vector.extract_strided_slice %3 {offsets = [0, 0], sizes = [128, 128], strides = [1, 1]} : vector<128x256xf32> to vector<128x128xf32>
    %c0_4 = arith.constant 0 : index
    %c0_5 = arith.constant 0 : index
    %5 = vector.load %arg4[%c0_4, %c0_5] : memref<1x128xf32, #tpu.memory_space<vmem>>, vector<1x128xf32>
    %6 = vector.broadcast %5 : vector<1x128xf32> to vector<128x128xf32>
    %7 = arith.addf %4, %6 : vector<128x128xf32>
    %c0_6 = arith.constant 0 : index
    %c0_7 = arith.constant 0 : index
    %c0_8 = arith.constant 0 : index
    %8 = vector.load %arg5[%c0_6, %c0_7, %c0_8] : memref<1x128x128xf32, #tpu.memory_space<vmem>>, vector<1x128x128xf32>
    %9 = vector.shape_cast %8 : vector<1x128x128xf32> to vector<128x128xf32>
    %cst_9 = arith.constant 0.899999976 : f32
    %10 = vector.broadcast %cst_9 : f32 to vector<128x128xf32>
    %11 = arith.mulf %10, %9 : vector<128x128xf32>
    %12 = arith.addf %11, %7 : vector<128x128xf32>
    %cst_10 = arith.constant 1.000000e+00 : f32
    %13 = vector.broadcast %cst_10 : f32 to vector<128x128xf32>
    %14 = arith.cmpf oge, %12, %13 : vector<128x128xf32>
    %15 = arith.extui %14 : vector<128x128xi1> to vector<128x128xi32>
    %16 = arith.sitofp %15 : vector<128x128xi32> to vector<128x128xf32>
    %cst_11 = arith.constant 1.000000e+00 : f32
    %17 = vector.broadcast %cst_11 : f32 to vector<128x128xf32>
    %18 = arith.mulf %16, %17 : vector<128x128xf32>
    %19 = arith.subf %12, %18 : vector<128x128xf32>
    %c0_12 = arith.constant 0 : index
    %c0_13 = arith.constant 0 : index
    %c0_14 = arith.constant 0 : index
    %20 = vector.load %arg7[%c0_12, %c0_13, %c0_14] : memref<1x128x128xf32, #tpu.memory_space<vmem>>, vector<1x128x128xf32>
    %21 = vector.shape_cast %20 : vector<1x128x128xf32> to vector<128x128xf32>
    %22 = vector.shape_cast %19 : vector<128x128xf32> to vector<1x128x128xf32>
    tpu.vector_store %arg7[%c0_12, %c0_13, %c0_14], %22 {strides = array<i32>} : memref<1x128x128xf32, #tpu.memory_space<vmem>>, vector<1x128x128xf32>,
    %23 = vector.extract_strided_slice %3 {offsets = [0, 128], sizes = [128, 128], strides = [1, 1]} : vector<128x256xf32> to vector<128x128xf32>
    %24 = arith.addf %16, %23 : vector<128x128xf32>
    %c0_15 = arith.constant 0 : index
    %c0_16 = arith.constant 0 : index
    %c0_17 = arith.constant 0 : index
    %25 = vector.load %arg6[%c0_15, %c0_16, %c0_17] : memref<1x128x128xf32, #tpu.memory_space<vmem>>, vector<1x128x128xf32>
    %26 = vector.shape_cast %25 : vector<1x128x128xf32> to vector<128x128xf32>
    %27 = vector.shape_cast %24 : vector<128x128xf32> to vector<1x128x128xf32>
    tpu.vector_store %arg6[%c0_15, %c0_16, %c0_17], %27 {strides = array<i32>} : memref<1x128x128xf32, #tpu.memory_space<vmem>>, vector<1x128x128xf32>,
    return
  }
  func.func @transform_0(%arg0: i32, %arg1: i32) -> (i32, i32, i32) {
    %c0_i32 = arith.constant 0 : i32
    %c0_i32_0 = arith.constant 0 : i32
    return %arg0, %arg1, %c0_i32 : i32, i32, i32
  }
  func.func @transform_1(%arg0: i32, %arg1: i32) -> (i32, i32) {
    %c0_i32 = arith.constant 0 : i32
    %c0_i32_0 = arith.constant 0 : i32
    %c0_i32_1 = arith.constant 0 : i32
    return %c0_i32, %c0_i32_0 : i32, i32
  }
  func.func @transform_2(%arg0: i32, %arg1: i32) -> (i32, i32) {
    %c0_i32 = arith.constant 0 : i32
    %c0_i32_0 = arith.constant 0 : i32
    %c0_i32_1 = arith.constant 0 : i32
    return %c0_i32, %c0_i32_0 : i32, i32
  }
  func.func @transform_3(%arg0: i32, %arg1: i32) -> (i32, i32, i32) {
    %c0_i32 = arith.constant 0 : i32
    %c0_i32_0 = arith.constant 0 : i32
    return %arg0, %arg1, %c0_i32 : i32, i32, i32
  }
  func.func @transform_4(%arg0: i32, %arg1: i32) -> (i32, i32, i32) {
    %c0_i32 = arith.constant 0 : i32
    %c0_i32_0 = arith.constant 0 : i32
    return %arg0, %arg1, %c0_i32 : i32, i32, i32
  }
  func.func @transform_5(%arg0: i32, %arg1: i32) -> (i32, i32, i32) {
    %c0_i32 = arith.constant 0 : i32
    %c0_i32_0 = arith.constant 0 : i32
    return %arg0, %arg1, %c0_i32 : i32, i32, i32
  }
}

</mosaic_0001>

<bundles_post_ra>
// kernel: blockgen_forward.1
= control target key start
LH: loop header
LB: loop body
LE: loop exit
PB: predicated region body
PF: predicated region fallthrough
CT: control target
= control target key end

     0   :  { %s1092_s18 = smov 0   ;;  %s1094_s19 = smov 0   ;;  %s1297_s0 = inlined_call_operand.vmem [shape: bf16[2,256,36], index: 0, kind: input, shape index: {}]   ;;  %s1298_s1 = inlined_call_operand.vmem [shape: bf16[36,256], index: 1, kind: input, shape index: {}]   ;;  %s1299_s2 = inlined_call_operand.vmem [shape: f32[1,128], index: 2, kind: input, shape index: {}]   ;;  %s1300_s3 = inlined_call_operand.vmem [shape: f32[2,256,128], index: 3, kind: input, shape index: {}, may-alias: {3,5}]   ;;  %s1301_s4 = inlined_call_operand.vmem [shape: f32[2,256,128], index: 4, kind: output, shape index: {0}]   ;;  %s1302_s5 = inlined_call_operand.vmem [shape: f32[2,256,128], index: 5, kind: output, shape index: {1}, may-alias: {3,5}]  }
   0x1   :  { %s1096_s20 = smov 0   ;;  %s1098_s21 = smov 0  }
   0x2   :  { %s1100_s22 = smov 0  }
   0x3 LB: > { %s25_s23 = sadd.s32 1, %s1050_s20  ;;  %s28_s24 = sadd.s32 1, %s1054_s21  ;;  %s1058_s22 = sphi %s1100_s22, %s16_s22   ;;  %s1054_s21 = sphi %s1098_s21, %s1306_s21   ;;  %s1050_s20 = sphi %s1096_s20, %s1305_s20   ;;  %s1046_s19 = sphi %s1094_s19, %s1304_s19   ;;  %s1042_s18 = sphi %s1092_s18, %s1303_s18  }
   0x4   : > { %p26_p0 = scmp.ge.s32.totalorder %s25_s23, 2  ;;  %p901_p1 = scmp.ge.s32.totalorder %s1058_s22, 1 }
   0x5   : > { %p230_p2 = scmp.lt.s32.totalorder %s1058_s22, 5 }
   0x6   : > { %s1308_s23 = smov (%p26_p0, %s25_s23), 0  ;;  %s1310_s24 = smov (!%p26_p0, %s28_s24), %s1054_s21 }
   0x7   : > { %p231_p3 = pnand %p901_p1, %p230_p2  ;;  %p30_p4 = scmp.ge.s32.totalorder %s1310_s24, 2 }
   0x8   : > { %s902_s29 = sshll.u32 (!%p231_p3), %s1042_s18, 4  ;;  %p285_p5 = scmp.lt.s32.totalorder (!%p231_p3), %s1046_s19, 1 }
   0x9   : > { %s1312_s24 = smov (%p30_p4, %s1310_s24), 0  ;;  %234 = sbr.rel (%p231_p3) target bundleno = 261 (0x105), region = 36 }
   0xa   : > { %p287_p6 = scmp.lt.s32.totalorder (!%p231_p3), %s902_s29, 31 }
   0xe   : > { %v345_v0 = vld [vmem:[%s1298_s1 + $0x20] sm:$0x33]  ;;  %vm436_vm0 = vcmask 1041408   ;;  %v1006_v3 = vld [vmem:[%s1298_s1 + $0x14] ss:$8 sps:$4 sm:$0xff]   ;;  %v1060_v4 = vmov 0  }
   0xf   : > { %v927_v1 = vcombine.high %v345_v0, %v345_v0  ;;  %v926_v2 = vcombine.low %v345_v0, %v345_v0  ;;  %475 = vmatprep.mubr.bf16.mxu0 %v1060_v4  ;;  %515 = vmatprep.mubr.bf16.mxu1 %v1060_v4  ;;  %v1008_v6 = vld [vmem:[%s1298_s1 + $0x10] ss:$8 sps:$4 sm:$0xff]   ;;  %s1314_s19 = smov (!%p285_p5, %s1046_s19), 1  ;;  %v1009_v7 = vld [vmem:[%s1298_s1 + $0x4] ss:$8 sps:$4 sm:$0xff]   ;;  %s1316_s29 = smov (!%p287_p6, %s902_s29), 31 }
  0x10   : > { %s903_s9 = sshll.u32 %s1314_s19, 5  ;;  %v1011_v8 = vld [vmem:[%s1298_s1] ss:$8 sps:$4 sm:$0xff]   ;;  %vm411_vm1 = vcmask 293888   ;;  %v1061_v49 = vmov 0.0  }
  0x11   : > { %928 = vmatprep.subr.msk.bf16.mxu0 %vm436_vm0, %v927_v1  ;;  %956 = vmatprep.subr.msk.bf16.mxu1 %vm436_vm0, %v927_v1  ;;  %v438_v5 = vsel %vm436_vm0, %v926_v2, 0  ;;  %s1141_s10 = sadd.s32 %s903_s9, %s1316_s29  ;;  %v1172_v19 = vld [vmem:[%s1299_s2] ss:$0 sm:$0xff] }
  0x12   : > { %454 = vmatpush1.bf16.msra.mxu0 %v438_v5  ;;  %959 = vmatpush1.bf16.msra.mxu1 %v438_v5  ;;  %s904_s13 = sshll.u32 %s1141_s10, 2  ;;  %s1159_s17 = sshll.u32 %s1141_s10, 3 }
  0x13   : > { %455 = vmatprep.subr.bf16.mxu0 %v1006_v3  ;;  %957 = vmatprep.subr.bf16.mxu1 %v1006_v3  ;;  %s292_s16 = scalar_lea.vmem %s1297_s0, %s904_s13  ;;  %s1165_s25 = scalar_lea.vmem %s1300_s3, %s1159_s17 }
  0x14   : > { %v1012_v9 = vld [vmem:[%s292_s16] sm:$0xff]   ;;  %v1014_v11 = vld [vmem:[%s292_s16 + $0x8] sm:$0xff]   ;;  %v1016_v13 = vld [vmem:[%s292_s16 + $0x10] sm:$0xff]   ;;  %s1199_s30 = scalar_lea.vmem %s1302_s5, %s1159_s17  ;;  %s1205_s8 = scalar_lea.vmem %s1301_s4, %s1159_s17 }
  0x15   : > { %v1013_v10 = vld [vmem:[%s292_s16 + $0x20] sm:$0xff]   ;;  %v1015_v12 = vld [vmem:[%s292_s16 + $0x28] sm:$0xff]   ;;  %v1017_v14 = vld [vmem:[%s292_s16 + $0x30] sm:$0xff]  }
  0x16   : > { %456 = vmatpush1.bf16.msra.mxu0 %v1008_v6  ;;  %960 = vmatpush1.bf16.msra.mxu1 %v1008_v6  ;;  %v1018_v15 = vld [vmem:[%s292_s16 + $0x18] sm:$0xff]   ;;  %v579_v17 = vld [vmem:[%s1165_s25] sm:$0xff]  ;;  %v580_v22 = vld [vmem:[%s1165_s25 + $0x8] sm:$0xff] }
  0x17   : > { %457 = vmatprep.subr.bf16.mxu0 %v1009_v7  ;;  %958 = vmatprep.subr.bf16.mxu1 %v1009_v7  ;;  %v1019_v16 = vld [vmem:[%s292_s16 + $0x38] sm:$0xff]   ;;  %v587_v18 = vld [vmem:[%s1165_s25 + $0x40] sm:$0xff]  ;;  %v595_v20 = vmul.f32 0.9, %v579_v17  ;;  %v588_v25 = vld [vmem:[%s1165_s25 + $0x48] sm:$0xff] }
  0x18   : > { %v603_v21 = vmul.f32 0.9, %v587_v18  ;;  %v581_v26 = vld [vmem:[%s1165_s25 + $0x10] sm:$0xff]  ;;  %v596_v32 = vmul.f32 0.9, %v580_v22  ;;  %v582_v40 = vld [vmem:[%s1165_s25 + $0x18] sm:$0xff] }
  0x19   : > { %v589_v29 = vld [vmem:[%s1165_s25 + $0x50] sm:$0xff]  ;;  %v604_v35 = vmul.f32 0.9, %v588_v25  ;;  %v597_v36 = vmul.f32 0.9, %v581_v26  ;;  %v590_v41 = vld [vmem:[%s1165_s25 + $0x58] sm:$0xff] }
  0x1a   : > { %458 = vmatpush1.bf16.msra.mxu0 %v1011_v8  ;;  %961 = vmatpush1.bf16.msra.mxu1 %v1011_v8  ;;  %v605_v39 = vmul.f32 0.9, %v589_v29  ;;  %v583_v42 = vld [vmem:[%s1165_s25 + $0x20] sm:$0xff]  ;;  %v1187_v46 = vld [vmem:[%s1165_s25 + $0x28] sm:$0xff]  ;;  %v1193_v48 = vld [vmem:[%s1165_s25 + $0x30] sm:$0xff] }
  0x1b   : > { %v591_v43 = vld [vmem:[%s1165_s25 + $0x60] sm:$0xff]  ;;  %v1190_v47 = vld [vmem:[%s1165_s25 + $0x68] sm:$0xff]  ;;  %v1210_v54 = vld [vmem:[%s1165_s25 + $0x70] sm:$0xff]  ;;  %v598_v5 = vmul.f32 0.9, %v582_v40 }
  0x1c   : > { %v1213_v55 = vld [vmem:[%s1165_s25 + $0x38] sm:$0xff]  ;;  %v606_v6 = vmul.f32 0.9, %v590_v41  ;;  %v607_v25 = vmul.f32 0.9, %v591_v43 }
  0x1d   : > { %929 = vmatmul.mubr.msk.bf16.vlgmr.msra.gmra.mxu0 %vm411_vm1, %v1012_v9  ;;  %933 = vmatmul.mubr.msk.bf16.vlgmr.msra.gmra.mxu1 %vm411_vm1, %v1013_v10  ;;  %v1216_v56 = vld [vmem:[%s1165_s25 + $0x78] sm:$0xff] }
  0x1e   : > { %485 = vmatprep.mubr.bf16.mxu0 %v1060_v4  ;;  %525 = vmatprep.mubr.bf16.mxu1 %v1060_v4 }
  0x25   : > { %930 = vmatmul.mubr.msk.bf16.gmra.mxu0 %vm411_vm1, %v1014_v11  ;;  %934 = vmatmul.mubr.msk.bf16.gmra.mxu1 %vm411_vm1, %v1015_v12 }
  0x26   : > { %495 = vmatprep.mubr.bf16.mxu0 %v1060_v4  ;;  %535 = vmatprep.mubr.bf16.mxu1 %v1060_v4 }
  0x2d   : > { %931 = vmatmul.mubr.msk.bf16.gmra.mxu0 %vm411_vm1, %v1016_v13  ;;  %935 = vmatmul.mubr.msk.bf16.gmra.mxu1 %vm411_vm1, %v1017_v14 }
  0x2e   : > { %505 = vmatprep.mubr.bf16.mxu0 %v1060_v4  ;;  %545 = vmatprep.mubr.bf16.mxu1 %v1060_v4 }
  0x35   : > { %932 = vmatmul.mubr.msk.bf16.gmra.mxu0 %vm411_vm1, %v1018_v15  ;;  %936 = vmatmul.mubr.msk.bf16.gmra.mxu1 %vm411_vm1, %v1019_v16 }
  0xdd   : > { %v477_v23 = vpop.f32.mrf.mxu0  ;;  %v517_v24 = vpop.f32.mrf.mxu1 }
  0xde   : > { %v563_v27 = vadd.f32 %v1172_v19, %v477_v23  ;;  %v571_v28 = vadd.f32 %v1172_v19, %v517_v24  ;;  %v599_v24 = vmul.f32 0.9, %v583_v42 }
  0xdf   : > { %v479_v30 = vpop.f32.mrf.mxu0  ;;  %v519_v31 = vpop.f32.mrf.mxu1 }
  0xe0   : > { %v611_v33 = vadd.f32 %v595_v20, %v563_v27  ;;  %v619_v34 = vadd.f32 %v603_v21, %v571_v28 }
  0xe1   : > { %v481_v37 = vpop.f32.mrf.mxu0  ;;  %v521_v38 = vpop.f32.mrf.mxu1 }
  0xe2   : > { %vm627_vm2 = vcmp.ge.f32.partialorder %v611_v33, 1.0  ;;  %vm635_vm3 = vcmp.ge.f32.partialorder %v619_v34, 1.0  ;;  %v564_v44 = vadd.f32 %v1172_v19, %v481_v37  ;;  %v572_v45 = vadd.f32 %v1172_v19, %v521_v38 }
  0xe3   : > { %v938_v50 = vsel %vm627_vm2, 1.0, %v1061_v49  ;;  %v946_v51 = vsel %vm635_vm3, 1.0, %v1061_v49  ;;  %v483_v52 = vpop.f32.mrf.mxu0  ;;  %v523_v53 = vpop.f32.mrf.mxu1  ;;  %v600_v38 = vmul.f32 0.9, %v1187_v46 }
  0xe4   : > { %v675_v57 = vsub.f32 %v611_v33, %v938_v50  ;;  %v707_v58 = vadd.f32 %v938_v50, %v479_v30  ;;  %v683_v59 = vsub.f32 %v619_v34, %v946_v51  ;;  %v715_v60 = vadd.f32 %v946_v51, %v519_v31 }
  0xe5   : > { %v612_v61 = vadd.f32 %v596_v32, %v564_v44  ;;  %v620_v62 = vadd.f32 %v604_v35, %v572_v45  ;;  %v487_v63 = vpop.f32.mrf.mxu0  ;;  %v527_v0 = vpop.f32.mrf.mxu1 }
  0xe6   : > { %723 = vst [vmem:[%s1205_s8] sm:$0xff] %v707_v58  ;;  %731 = vst [vmem:[%s1205_s8 + $0x40] sm:$0xff] %v715_v60  ;;  %v565_v1 = vadd.f32 %v1172_v19, %v487_v63  ;;  %v573_v2 = vadd.f32 %v1172_v19, %v527_v0 }
  0xe7   : > { %691 = vst [vmem:[%s1199_s30] sm:$0xff] %v675_v57  ;;  %699 = vst [vmem:[%s1199_s30 + $0x40] sm:$0xff] %v683_v59  ;;  %vm628_vm4 = vcmp.ge.f32.partialorder %v612_v61, 1.0  ;;  %vm636_vm5 = vcmp.ge.f32.partialorder %v620_v62, 1.0  ;;  %v489_v3 = vpop.f32.mrf.mxu0  ;;  %v529_v4 = vpop.f32.mrf.mxu1 }
  0xe8   : > { %v939_v7 = vsel %vm628_vm4, 1.0, %v1061_v49  ;;  %v947_v8 = vsel %vm636_vm5, 1.0, %v1061_v49  ;;  %v613_v9 = vadd.f32 %v597_v36, %v565_v1  ;;  %v621_v10 = vadd.f32 %v605_v39, %v573_v2 }
  0xe9   : > { %v676_v11 = vsub.f32 %v612_v61, %v939_v7  ;;  %v708_v12 = vadd.f32 %v939_v7, %v483_v52  ;;  %v684_v13 = vsub.f32 %v620_v62, %v947_v8  ;;  %v716_v14 = vadd.f32 %v947_v8, %v523_v53  ;;  %v491_v15 = vpop.f32.mrf.mxu0  ;;  %v531_v16 = vpop.f32.mrf.mxu1 }
  0xea   : > { %vm629_vm6 = vcmp.ge.f32.partialorder %v613_v9, 1.0  ;;  %vm637_vm7 = vcmp.ge.f32.partialorder %v621_v10, 1.0  ;;  %v566_v17 = vadd.f32 %v1172_v19, %v491_v15  ;;  %v574_v18 = vadd.f32 %v1172_v19, %v531_v16 }
  0xeb   : > { %724 = vst [vmem:[%s1205_s8 + $0x8] sm:$0xff] %v708_v12  ;;  %732 = vst [vmem:[%s1205_s8 + $0x48] sm:$0xff] %v716_v14  ;;  %v940_v20 = vsel %vm629_vm6, 1.0, %v1061_v49  ;;  %v948_v21 = vsel %vm637_vm7, 1.0, %v1061_v49  ;;  %v493_v22 = vpop.f32.mrf.mxu0  ;;  %v533_v23 = vpop.f32.mrf.mxu1  ;;  %v608_v39 = vmul.f32 0.9, %v1190_v47 }
  0xec   : > { %692 = vst [vmem:[%s1199_s30 + $0x8] sm:$0xff] %v676_v11  ;;  %700 = vst [vmem:[%s1199_s30 + $0x48] sm:$0xff] %v684_v13  ;;  %v677_v26 = vsub.f32 %v613_v9, %v940_v20  ;;  %v709_v27 = vadd.f32 %v940_v20, %v489_v3  ;;  %v685_v28 = vsub.f32 %v621_v10, %v948_v21  ;;  %v601_v61 = vmul.f32 0.9, %v1193_v48 }
  0xed   : > { %v717_v29 = vadd.f32 %v948_v21, %v529_v4  ;;  %v614_v30 = vadd.f32 %v598_v5, %v566_v17  ;;  %v622_v31 = vadd.f32 %v606_v6, %v574_v18  ;;  %v497_v32 = vpop.f32.mrf.mxu0  ;;  %v537_v33 = vpop.f32.mrf.mxu1  ;;  %v609_v62 = vmul.f32 0.9, %v1210_v54 }
  0xee   : > { %725 = vst [vmem:[%s1205_s8 + $0x10] sm:$0xff] %v709_v27  ;;  %v567_v34 = vadd.f32 %v1172_v19, %v497_v32  ;;  %v575_v35 = vadd.f32 %v1172_v19, %v537_v33  ;;  %693 = vst [vmem:[%s1199_s30 + $0x10] sm:$0xff] %v677_v26  ;;  %v602_v9 = vmul.f32 0.9, %v1213_v55  ;;  %v610_v10 = vmul.f32 0.9, %v1216_v56 }
  0xef   : > { %733 = vst [vmem:[%s1205_s8 + $0x50] sm:$0xff] %v717_v29  ;;  %701 = vst [vmem:[%s1199_s30 + $0x50] sm:$0xff] %v685_v28  ;;  %vm630_vm8 = vcmp.ge.f32.partialorder %v614_v30, 1.0  ;;  %vm638_vm9 = vcmp.ge.f32.partialorder %v622_v31, 1.0  ;;  %v499_v36 = vpop.f32.mrf.mxu0  ;;  %v539_v37 = vpop.f32.mrf.mxu1 }
  0xf0   : > { %v941_v40 = vsel %vm630_vm8, 1.0, %v1061_v49  ;;  %v949_v41 = vsel %vm638_vm9, 1.0, %v1061_v49  ;;  %v615_v42 = vadd.f32 %v599_v24, %v567_v34  ;;  %v623_v43 = vadd.f32 %v607_v25, %v575_v35 }
  0xf1   : > { %v678_v44 = vsub.f32 %v614_v30, %v941_v40  ;;  %v710_v45 = vadd.f32 %v941_v40, %v493_v22  ;;  %v686_v50 = vsub.f32 %v622_v31, %v949_v41  ;;  %v718_v51 = vadd.f32 %v949_v41, %v533_v23  ;;  %v501_v52 = vpop.f32.mrf.mxu0  ;;  %v541_v53 = vpop.f32.mrf.mxu1 }
  0xf2   : > { %vm631_vm10 = vcmp.ge.f32.partialorder %v615_v42, 1.0  ;;  %vm639_vm11 = vcmp.ge.f32.partialorder %v623_v43, 1.0  ;;  %v568_v46 = vadd.f32 %v1172_v19, %v501_v52  ;;  %v576_v47 = vadd.f32 %v1172_v19, %v541_v53 }
  0xf3   : > { %726 = vst [vmem:[%s1205_s8 + $0x18] sm:$0xff] %v710_v45  ;;  %734 = vst [vmem:[%s1205_s8 + $0x58] sm:$0xff] %v718_v51  ;;  %v942_v57 = vsel %vm631_vm10, 1.0, %v1061_v49  ;;  %v950_v58 = vsel %vm639_vm11, 1.0, %v1061_v49  ;;  %v503_v59 = vpop.f32.mrf.mxu0  ;;  %v543_v60 = vpop.f32.mrf.mxu1 }
  0xf4   : > { %694 = vst [vmem:[%s1199_s30 + $0x18] sm:$0xff] %v678_v44  ;;  %702 = vst [vmem:[%s1199_s30 + $0x58] sm:$0xff] %v686_v50  ;;  %v679_v63 = vsub.f32 %v615_v42, %v942_v57  ;;  %v711_v0 = vadd.f32 %v942_v57, %v499_v36  ;;  %v687_v1 = vsub.f32 %v623_v43, %v950_v58 }
  0xf5   : > { %v719_v2 = vadd.f32 %v950_v58, %v539_v37  ;;  %v616_v3 = vadd.f32 %v600_v38, %v568_v46  ;;  %v624_v4 = vadd.f32 %v608_v39, %v576_v47  ;;  %v507_v5 = vpop.f32.mrf.mxu0  ;;  %v547_v6 = vpop.f32.mrf.mxu1 }
  0xf6   : > { %727 = vst [vmem:[%s1205_s8 + $0x20] sm:$0xff] %v711_v0  ;;  %v569_v7 = vadd.f32 %v1172_v19, %v507_v5  ;;  %v577_v48 = vadd.f32 %v1172_v19, %v547_v6  ;;  %695 = vst [vmem:[%s1199_s30 + $0x20] sm:$0xff] %v679_v63 }
  0xf7   : > { %735 = vst [vmem:[%s1205_s8 + $0x60] sm:$0xff] %v719_v2  ;;  %703 = vst [vmem:[%s1199_s30 + $0x60] sm:$0xff] %v687_v1  ;;  %vm632_vm12 = vcmp.ge.f32.partialorder %v616_v3, 1.0  ;;  %vm640_vm13 = vcmp.ge.f32.partialorder %v624_v4, 1.0  ;;  %v509_v54 = vpop.f32.mrf.mxu0  ;;  %v549_v8 = vpop.f32.mrf.mxu1 }
  0xf8   : > { %v943_v11 = vsel %vm632_vm12, 1.0, %v1061_v49  ;;  %v951_v12 = vsel %vm640_vm13, 1.0, %v1061_v49  ;;  %v617_v13 = vadd.f32 %v601_v61, %v569_v7  ;;  %v625_v14 = vadd.f32 %v609_v62, %v577_v48 }
  0xf9   : > { %v680_v15 = vsub.f32 %v616_v3, %v943_v11  ;;  %v712_v16 = vadd.f32 %v943_v11, %v503_v59  ;;  %v688_v17 = vsub.f32 %v624_v4, %v951_v12  ;;  %v720_v18 = vadd.f32 %v951_v12, %v543_v60  ;;  %v511_v20 = vpop.f32.mrf.mxu0  ;;  %v551_v21 = vpop.f32.mrf.mxu1 }
  0xfa   : > { %vm633_vm14 = vcmp.ge.f32.partialorder %v617_v13, 1.0  ;;  %vm641_vm15 = vcmp.ge.f32.partialorder %v625_v14, 1.0  ;;  %v570_v55 = vadd.f32 %v1172_v19, %v511_v20  ;;  %v578_v56 = vadd.f32 %v1172_v19, %v551_v21 }
  0xfb   : > { %728 = vst [vmem:[%s1205_s8 + $0x28] sm:$0xff] %v712_v16  ;;  %736 = vst [vmem:[%s1205_s8 + $0x68] sm:$0xff] %v720_v18  ;;  %v944_v22 = vsel %vm633_vm14, 1.0, %v1061_v49  ;;  %v952_v23 = vsel %vm641_vm15, 1.0, %v1061_v49  ;;  %v513_v19 = vpop.f32.mrf.mxu0  ;;  %v553_v31 = vpop.f32.mrf.mxu1 }
  0xfc   : > { %696 = vst [vmem:[%s1199_s30 + $0x28] sm:$0xff] %v680_v15  ;;  %704 = vst [vmem:[%s1199_s30 + $0x68] sm:$0xff] %v688_v17  ;;  %v681_v24 = vsub.f32 %v617_v13, %v944_v22  ;;  %v713_v25 = vadd.f32 %v944_v22, %v509_v54  ;;  %v689_v26 = vsub.f32 %v625_v14, %v952_v23 }
  0xfd   : > { %v721_v27 = vadd.f32 %v952_v23, %v549_v8  ;;  %v618_v28 = vadd.f32 %v602_v9, %v570_v55  ;;  %v626_v29 = vadd.f32 %v610_v10, %v578_v56 }
  0xfe   : > { %729 = vst [vmem:[%s1205_s8 + $0x30] sm:$0xff] %v713_v25  ;;  %697 = vst [vmem:[%s1199_s30 + $0x30] sm:$0xff] %v681_v24 }
  0xff   : > { %737 = vst [vmem:[%s1205_s8 + $0x70] sm:$0xff] %v721_v27  ;;  %705 = vst [vmem:[%s1199_s30 + $0x70] sm:$0xff] %v689_v26  ;;  %vm634_vm0 = vcmp.ge.f32.partialorder %v618_v28, 1.0  ;;  %vm642_vm1 = vcmp.ge.f32.partialorder %v626_v29, 1.0 }
 0x100   : > { %v945_v30 = vsel %vm634_vm0, 1.0, %v1061_v49  ;;  %v953_v32 = vsel %vm642_vm1, 1.0, %v1061_v49 }
 0x101   : > { %v682_v33 = vsub.f32 %v618_v28, %v945_v30  ;;  %v714_v34 = vadd.f32 %v945_v30, %v513_v19  ;;  %v690_v35 = vsub.f32 %v626_v29, %v953_v32  ;;  %v722_v36 = vadd.f32 %v953_v32, %v553_v31 }
 0x103   : > { %698 = vst [vmem:[%s1199_s30 + $0x38] sm:$0xff] %v682_v33  ;;  %730 = vst [vmem:[%s1205_s8 + $0x38] sm:$0xff] %v714_v34 }
 0x104   : > { %706 = vst [vmem:[%s1199_s30 + $0x78] sm:$0xff] %v690_v35  ;;  %738 = vst [vmem:[%s1205_s8 + $0x78] sm:$0xff] %v722_v36 }
 0x105 PF: > { %s16_s22 = sadd.s32 1, %s1058_s22   ;;  %s1303_s18 = smov %s1050_s20 }
 0x106   : > { %p13_p7 = scmp.ge.s32.totalorder %s16_s22, 6   ;;  %s1304_s19 = smov %s1054_s21 }
 0x107   : > { %s1305_s20 = smov %s1308_s23  ;;  %s1306_s21 = smov %s1312_s24 }
 0x108   :  { %15 = sbr.rel (!%p13_p7) target bundleno = 3 (0x3), region = 81 }

</bundles_post_ra>
